<compile_context>
chip_gen: v5e
topology: v5e:2x2
jax: 0.10.0
libtpu: 0.0.40
codegen_flags: <defaults>
</compile_context>

<pallas_src>
import jax
import jax.numpy as jnp
from jax.experimental import pallas as pl
from jax.experimental.pallas import tpu as pltpu

_LOOP_RESULT = sum(range(5))          # = 10, compile-time Python scalar
_FAST_PATH_BYTES = 2 << 20            # per-operand threshold for the jnp fast path


def _elementwise_kernel(x1_ref, x2_ref, x3_ref, x4_ref, x5_ref,
                        sum_ref, prod_ref, div_ref):
    x1 = x1_ref[...]
    sum_ref[...] = x1 + x2_ref[...]
    prod_ref[...] = x3_ref[...] * x4_ref[...]
    # Exact division keeps 1e-5 closeness to the PyTorch reference; the op is
    # HBM-bound so compute precision is not the limiter.
    div_ref[...] = x5_ref[...] / (x1 + 1.0)


def _jnp_forward(x1, x2, x3, x4, x5):
    return (x1 + x2, x3 * x4, x5 / (x1 + 1), _LOOP_RESULT)


def _sublane_multiple(dtype):
    bits = jnp.dtype(dtype).itemsize * 8
    if bits >= 32:
        return 8
    if bits == 16:
        return 16
    return 32


def _slab_geometry(total):
    """Largest LANES in {1024,512,256,128} dividing total exactly; pad only as
    a last resort."""
    for lanes in (1024, 512, 256, 128):
        if total % lanes == 0:
            return lanes, total // lanes, 0
    lanes = 128
    rows = pl.cdiv(total, lanes)
    return lanes, rows, rows * lanes - total


def _pick_tile_r(rows, sub, target=512):
    """Row-tile: multiple of the dtype's sublane quantum, dividing rows when
    possible, close to `target`, and giving >=2 grid steps when feasible."""
    if rows <= target:
        half = rows // 2
        if rows % 2 == 0 and half > 0 and half % sub == 0:
            return half                    # >=2 steps -> both v7x TCs get work
        return rows                        # full-extent tile (always legal)
    cap = max((target // sub) * sub, sub)
    for cand in range(cap, 0, -sub):
        if rows % cand == 0:
            return cand
    return cap                             # non-dividing grid; tail writes masked


def pt_module_forward(x1, x2, x3, x4, x5, *, force_pallas=False):
    inputs = (x1, x2, x3, x4, x5)
    orig_shape = x1.shape
    dtype = x1.dtype
    for a in inputs:
        assert a.shape == orig_shape, "all five inputs must share the same shape"

    # Non-float or mixed dtypes: use plain jnp so true-division semantics match
    # PyTorch exactly (Pallas out_shape would otherwise truncate the division).
    if (not jnp.issubdtype(dtype, jnp.floating)
            or any(a.dtype != dtype for a in inputs)):
        return _jnp_forward(*inputs)

    total = 1
    for d in orig_shape:
        total *= int(d)
    total = max(total, 1)
    itemsize = jnp.dtype(dtype).itemsize

    # Small-input fast path: launch overhead dominates, XLA fuses this into a
    # single HBM pass with no kernel at all.
    if not force_pallas and total * itemsize <= _FAST_PATH_BYTES:
        return _jnp_forward(*inputs)

    # --- lane-dense slab geometry (no padding in the common case) ------------
    lanes, rows, pad = _slab_geometry(total)
    sub = _sublane_multiple(dtype)
    tile_r = _pick_tile_r(rows, sub)

    def to_slab(a):
        flat = a.reshape(-1)
        if pad:
            # Last resort only. Zero padding is numerically safe for the
            # division: 0 / (0 + 1) = 0, no NaNs.
            flat = jnp.pad(flat, (0, pad))
        return flat.reshape(rows, lanes)

    slabs = [to_slab(a) for a in inputs]

    grid = (pl.cdiv(rows, tile_r),)
    spec = pl.BlockSpec((tile_r, lanes), lambda i: (i, 0))
    out_sds = jax.ShapeDtypeStruct((rows, lanes), dtype)

    # 5 input + 3 output streams, double-buffered by the pipeline.
    footprint = 8 * 2 * tile_r * lanes * itemsize
    vmem_limit = int(min(max(32 << 20, footprint + (8 << 20)), 48 << 20))

    sum_s, prod_s, div_s = pl.pallas_call(
        _elementwise_kernel,
        out_shape=(out_sds, out_sds, out_sds),
        grid=grid,
        in_specs=[spec] * 5,
        out_specs=(spec, spec, spec),
        compiler_params=pltpu.CompilerParams(
            # Independent row tiles -> shard across TensorCores on v7x;
            # harmless no-op on single-TC v5e/v6e.
            dimension_semantics=("parallel",),
            vmem_limit_bytes=vmem_limit),
        cost_estimate=pl.CostEstimate(
            flops=3 * total,
            transcendentals=total,                    # reciprocal in the divide
            bytes_accessed=8 * total * itemsize),     # 5 reads + 3 writes
    )(*slabs)

    def from_slab(s):
        flat = s.reshape(-1)
        if pad:
            flat = flat[:total]
        return flat.reshape(orig_shape)

    return (from_slab(sum_s),
            from_slab(prod_s),
            from_slab(div_s),
            _LOOP_RESULT)


if __name__ == "__main__":
    key = jax.random.PRNGKey(0)
    k1, k2, k3, k4, k5 = jax.random.split(key, 5)
    shape = (2, 4, 16, 16)  # B, C, H, W
    x1 = jax.random.normal(k1, shape, dtype=jnp.float32)
    x2 = jax.random.normal(k2, shape, dtype=jnp.float32)
    x3 = jax.random.normal(k3, shape, dtype=jnp.float32)
    x4 = jax.random.normal(k4, shape, dtype=jnp.float32)
    x5 = jax.random.normal(k5, shape, dtype=jnp.float32)

    # Force the Pallas path so the kernel itself is exercised even at this
    # tiny (fast-path-eligible) size.
    sum_r, prod_r, div_r, loop_r = pt_module_forward(
        x1, x2, x3, x4, x5, force_pallas=True)
    jax.block_until_ready((sum_r, prod_r, div_r))

    # Correctness check against plain-JAX reference.
    assert jnp.allclose(sum_r, x1 + x2, atol=1e-6)
    assert jnp.allclose(prod_r, x3 * x4, atol=1e-6)
    assert jnp.allclose(div_r, x5 / (x1 + 1.0), atol=1e-5)
    assert loop_r == 10

    # Also exercise the default dispatch (small-input jnp fast path).
    s2, p2, d2, l2 = pt_module_forward(x1, x2, x3, x4, x5)
    jax.block_until_ready((s2, p2, d2))
    assert jnp.allclose(s2, sum_r, atol=1e-6)
    assert jnp.allclose(p2, prod_r, atol=1e-6)
    assert jnp.allclose(d2, div_r, atol=1e-5)
    assert l2 == 10

    print("KERNEL_OK")
</pallas_src>

<mosaic_0001>
module attributes {stable_mosaic.version = 11 : i64} {
  func.func @_elementwise_kernel(%arg0: i32, %arg1: memref<2x1024xf32, #tpu.memory_space<vmem>>, %arg2: memref<2x1024xf32, #tpu.memory_space<vmem>>, %arg3: memref<2x1024xf32, #tpu.memory_space<vmem>>, %arg4: memref<2x1024xf32, #tpu.memory_space<vmem>>, %arg5: memref<2x1024xf32, #tpu.memory_space<vmem>>, %arg6: memref<2x1024xf32, #tpu.memory_space<vmem>>, %arg7: memref<2x1024xf32, #tpu.memory_space<vmem>>, %arg8: memref<2x1024xf32, #tpu.memory_space<vmem>>) attributes {dimension_semantics = [#tpu.dimension_semantics<parallel>], iteration_bounds = array<i64: 1>, scalar_prefetch = 0 : i64, scratch_operands = 0 : i64, tpu.core_type = #tpu.core_type<tc>, window_params = [{transform_indices = @transform_0, window_bounds = array<i64: 2, 1024>}, {transform_indices = @transform_1, window_bounds = array<i64: 2, 1024>}, {transform_indices = @transform_2, window_bounds = array<i64: 2, 1024>}, {transform_indices = @transform_3, window_bounds = array<i64: 2, 1024>}, {transform_indices = @transform_4, window_bounds = array<i64: 2, 1024>}, {transform_indices = @transform_5, window_bounds = array<i64: 2, 1024>}, {transform_indices = @transform_6, window_bounds = array<i64: 2, 1024>}, {transform_indices = @transform_7, window_bounds = array<i64: 2, 1024>}]} {
    %c0 = arith.constant 0 : index
    %c0_0 = arith.constant 0 : index
    %0 = vector.load %arg1[%c0, %c0_0] : memref<2x1024xf32, #tpu.memory_space<vmem>>, vector<2x1024xf32>
    %c0_1 = arith.constant 0 : index
    %c0_2 = arith.constant 0 : index
    %1 = vector.load %arg2[%c0_1, %c0_2] : memref<2x1024xf32, #tpu.memory_space<vmem>>, vector<2x1024xf32>
    %2 = arith.addf %0, %1 : vector<2x1024xf32>
    %c0_3 = arith.constant 0 : index
    %c0_4 = arith.constant 0 : index
    %3 = vector.load %arg6[%c0_3, %c0_4] : memref<2x1024xf32, #tpu.memory_space<vmem>>, vector<2x1024xf32>
    tpu.vector_store %arg6[%c0_3, %c0_4], %2 {strides = array<i32>} : memref<2x1024xf32, #tpu.memory_space<vmem>>, vector<2x1024xf32>,
    %c0_5 = arith.constant 0 : index
    %c0_6 = arith.constant 0 : index
    %4 = vector.load %arg3[%c0_5, %c0_6] : memref<2x1024xf32, #tpu.memory_space<vmem>>, vector<2x1024xf32>
    %c0_7 = arith.constant 0 : index
    %c0_8 = arith.constant 0 : index
    %5 = vector.load %arg4[%c0_7, %c0_8] : memref<2x1024xf32, #tpu.memory_space<vmem>>, vector<2x1024xf32>
    %6 = arith.mulf %4, %5 : vector<2x1024xf32>
    %c0_9 = arith.constant 0 : index
    %c0_10 = arith.constant 0 : index
    %7 = vector.load %arg7[%c0_9, %c0_10] : memref<2x1024xf32, #tpu.memory_space<vmem>>, vector<2x1024xf32>
    tpu.vector_store %arg7[%c0_9, %c0_10], %6 {strides = array<i32>} : memref<2x1024xf32, #tpu.memory_space<vmem>>, vector<2x1024xf32>,
    %c0_11 = arith.constant 0 : index
    %c0_12 = arith.constant 0 : index
    %8 = vector.load %arg5[%c0_11, %c0_12] : memref<2x1024xf32, #tpu.memory_space<vmem>>, vector<2x1024xf32>
    %cst = arith.constant 1.000000e+00 : f32
    %9 = vector.broadcast %cst : f32 to vector<2x1024xf32>
    %10 = arith.addf %0, %9 : vector<2x1024xf32>
    %11 = arith.divf %8, %10 : vector<2x1024xf32>
    %c0_13 = arith.constant 0 : index
    %c0_14 = arith.constant 0 : index
    %12 = vector.load %arg8[%c0_13, %c0_14] : memref<2x1024xf32, #tpu.memory_space<vmem>>, vector<2x1024xf32>
    tpu.vector_store %arg8[%c0_13, %c0_14], %11 {strides = array<i32>} : memref<2x1024xf32, #tpu.memory_space<vmem>>, vector<2x1024xf32>,
    return
  }
  func.func @transform_0(%arg0: i32) -> (i32, i32) {
    %c0_i32 = arith.constant 0 : i32
    %c0_i32_0 = arith.constant 0 : i32
    return %arg0, %c0_i32 : i32, i32
  }
  func.func @transform_1(%arg0: i32) -> (i32, i32) {
    %c0_i32 = arith.constant 0 : i32
    %c0_i32_0 = arith.constant 0 : i32
    return %arg0, %c0_i32 : i32, i32
  }
  func.func @transform_2(%arg0: i32) -> (i32, i32) {
    %c0_i32 = arith.constant 0 : i32
    %c0_i32_0 = arith.constant 0 : i32
    return %arg0, %c0_i32 : i32, i32
  }
  func.func @transform_3(%arg0: i32) -> (i32, i32) {
    %c0_i32 = arith.constant 0 : i32
    %c0_i32_0 = arith.constant 0 : i32
    return %arg0, %c0_i32 : i32, i32
  }
  func.func @transform_4(%arg0: i32) -> (i32, i32) {
    %c0_i32 = arith.constant 0 : i32
    %c0_i32_0 = arith.constant 0 : i32
    return %arg0, %c0_i32 : i32, i32
  }
  func.func @transform_5(%arg0: i32) -> (i32, i32) {
    %c0_i32 = arith.constant 0 : i32
    %c0_i32_0 = arith.constant 0 : i32
    return %arg0, %c0_i32 : i32, i32
  }
  func.func @transform_6(%arg0: i32) -> (i32, i32) {
    %c0_i32 = arith.constant 0 : i32
    %c0_i32_0 = arith.constant 0 : i32
    return %arg0, %c0_i32 : i32, i32
  }
  func.func @transform_7(%arg0: i32) -> (i32, i32) {
    %c0_i32 = arith.constant 0 : i32
    %c0_i32_0 = arith.constant 0 : i32
    return %arg0, %c0_i32 : i32, i32
  }
}

</mosaic_0001>

<bundles_post_ra>
// kernel: tpu_custom_call.1
= control target key start
LH: loop header
LB: loop body
LE: loop exit
PB: predicated region body
PF: predicated region fallthrough
CT: control target
= control target key end

     0   :  { %13 = vsyncpa [#allocation3], 0  ;;  %s490_s0 = inlined_call_operand.hbm [shape: f32[2,1024], index: 0, kind: input, shape index: {}]   ;;  %s491_s1 = inlined_call_operand.hbm [shape: f32[2,1024], index: 1, kind: input, shape index: {}]   ;;  %s492_s2 = inlined_call_operand.hbm [shape: f32[2,1024], index: 2, kind: input, shape index: {}]   ;;  %s493_s3 = inlined_call_operand.hbm [shape: f32[2,1024], index: 3, kind: input, shape index: {}]   ;;  %s494_s4 = inlined_call_operand.hbm [shape: f32[2,1024], index: 4, kind: input, shape index: {}]   ;;  %s495_s5 = inlined_call_operand.hbm [shape: f32[2,1024], index: 5, kind: output, shape index: {0}]   ;;  %s496_s6 = inlined_call_operand.hbm [shape: f32[2,1024], index: 6, kind: output, shape index: {1}]   ;;  %s497_s7 = inlined_call_operand.hbm [shape: f32[2,1024], index: 7, kind: output, shape index: {2}]  }
   0x1   :  { %14 = vsyncpa [#allocation6], 0 }
   0x2   :  { %15 = vsyncpa [#allocation9], 0 }
   0x3   :  { %16 = vsyncpa [#allocation4], 0  ;;  %s34_s26 = sshll.u32 %s491_s1, 4  ;;  %s35_s26 = int_to_ptr.hbm [resolvable:$true] %s34_s26 }
   0x4   :  { %17 = vsyncpa [#allocation13], 0  ;;  %s409_s27 = smov [#allocation5]   ;;  %s56_s8 = sshll.u32 %s493_s3, 4  ;;  %s57_s8 = int_to_ptr.hbm [resolvable:$true] %s56_s8 }
   0x5   :  { %s36_s28 = sshll.u32 %s409_s27, 4  ;;  %s410_s9 = smov [#allocation8]   ;;  %s37_s28 = int_to_ptr.vmem [resolvable:$true] %s36_s28 }
   0x6   :  { %39 = dma.hbm_to_vmem [thread:$0]  %s35_s26, 256, %s37_s28, [#allocation6]  }
   0x7   :  { %s58_s10 = sshll.u32 %s410_s9, 4  ;;  %s23_s13 = sshll.u32 %s490_s0, 4  ;;  %s59_s10 = int_to_ptr.vmem [resolvable:$true] %s58_s10  ;;  %s24_s13 = int_to_ptr.hbm [resolvable:$true] %s23_s13 }
   0x8   :  { %61 = dma.hbm_to_vmem [thread:$0]  %s57_s8, 256, %s59_s10, [#allocation9]  }
   0x9   :  { %s45_s15 = sshll.u32 %s492_s2, 4  ;;  %s411_s16 = smov [#allocation2]   ;;  %s46_s15 = int_to_ptr.hbm [resolvable:$true] %s45_s15 }
   0xa   :  { %s25_s17 = sshll.u32 %s411_s16, 4  ;;  %s412_s3 = smov [#allocation7]   ;;  %s26_s17 = int_to_ptr.vmem [resolvable:$true] %s25_s17 }
   0xb   :  { %28 = dma.hbm_to_vmem [thread:$0]  %s24_s13, 256, %s26_s17, [#allocation3]  }
   0xc   :  { %s47_s18 = sshll.u32 %s412_s3, 4  ;;  %s67_s21 = sshll.u32 %s494_s4, 4  ;;  %s48_s18 = int_to_ptr.vmem [resolvable:$true] %s47_s18  ;;  %s68_s21 = int_to_ptr.hbm [resolvable:$true] %s67_s21 }
   0xd   :  { %50 = dma.hbm_to_vmem [thread:$0]  %s46_s15, 256, %s48_s18, [#allocation6]  }
   0xe   :  { %s413_s0 = smov [#allocation10]  }
   0xf   :  { %s69_s22 = sshll.u32 %s413_s0, 4  ;;  %s70_s22 = int_to_ptr.vmem [resolvable:$true] %s69_s22 }
  0x10   :  { %72 = dma.hbm_to_vmem [thread:$0]  %s68_s21, 256, %s70_s22, [#allocation9]  }
  0x11   :  { %399 = dma.done.wait [#allocation3], 256  }
  0x12   :  { %400 = vsyncadd [#allocation3], 4294967040 }
  0x13   :  { %401 = dma.done.wait [#allocation6], 512  }
  0x14   :  { %402 = vsyncadd [#allocation6], 4294966784 }
  0x15   :  { %403 = dma.done.wait [#allocation9], 512  }
  0x16   :  { %404 = vsyncadd [#allocation9], 4294966784  ;;  %s414_s2 = smov [#allocation12]   ;;  %s163_s4 = sshll.u32 %s496_s6, 4  ;;  %v101_v0 = vld [vmem:[#allocation7] sm:$0xff]  ;;  %v103_v1 = vld [vmem:[#allocation8] sm:$0xff]  ;;  %s164_s4 = int_to_ptr.hbm [resolvable:$true] %s163_s4 }
  0x17   :  { %s472_s23 = sshll.u32 %s414_s2, 4  ;;  %v102_v2 = vld [vmem:[#allocation7 + $0x8] sm:$0xff]  ;;  %v105_v3 = vmul.f32 %v103_v1, %v101_v0  ;;  %v104_v4 = vld [vmem:[#allocation8 + $0x8] sm:$0xff]  ;;  %v93_v5 = vld [vmem:[#allocation2] sm:$0xff]  ;;  %s415_s26 = smov [#allocation11]   ;;  %s162_s23 = int_to_ptr.vmem [resolvable:$true] %s472_s23 }
  0x18   :  { %v95_v6 = vld [vmem:[#allocation5] sm:$0xff]  ;;  %s150_s27 = sshll.u32 %s415_s26, 4  ;;  %s152_s30 = sshll.u32 %s495_s5, 4  ;;  %v106_v7 = vmul.f32 %v104_v4, %v102_v2  ;;  %v111_v9 = vadd.f32 1.0, %v93_v5  ;;  %v94_v10 = vld [vmem:[#allocation2 + $0x8] sm:$0xff]  ;;  %v96_v11 = vld [vmem:[#allocation5 + $0x8] sm:$0xff]  ;;  %s151_s27 = int_to_ptr.vmem [resolvable:$true] %s150_s27  ;;  %s153_s30 = int_to_ptr.hbm [resolvable:$true] %s152_s30 }
  0x19   :  { %v97_v8 = vadd.f32 %v95_v6, %v93_v5  ;;  %107 = vst [vmem:[#allocation12] sm:$0xff] %v105_v3  ;;  %v98_v12 = vadd.f32 %v96_v11, %v94_v10  ;;  %v112_v13 = vadd.f32 1.0, %v94_v10  ;;  %v109_v30 = vld [vmem:[#allocation10] sm:$0xff]  ;;  %v110_v33 = vld [vmem:[#allocation10 + $0x8] sm:$0xff]  ;;  %s416_s5 = smov [#allocation14]   ;;  %s174_s10 = sshll.u32 %s497_s7, 4  ;;  %s175_s10 = int_to_ptr.hbm [resolvable:$true] %s174_s10 }
  0x1a   :  { %108 = vst [vmem:[#allocation12 + $0x8] sm:$0xff] %v106_v7  ;;  %203 = vrcp.f32 %v111_v9  ;;  %vm118_vm0 = vweird.f32 %v111_v9  ;;  %v124_v17 = vand.u32 2147483648, %v111_v9  ;;  %v122_v20 = vand.u32 2147483647, %v111_v9  ;;  %s172_s6 = sshll.u32 %s416_s5, 4  ;;  %s173_s6 = int_to_ptr.vmem [resolvable:$true] %s172_s6 }
  0x1b   :  { %99 = vst [vmem:[#allocation11] sm:$0xff] %v97_v8  ;;  %205 = vrcp.f32 %v112_v13  ;;  %166 = dma.vmem_to_hbm [thread:$0]  %s162_s23, 256, %s164_s4, [#allocation13]   ;;  %v139_v21 = vand.u32 2147483648, %v112_v13  ;;  %vm133_vm2 = vweird.f32 %v112_v13  ;;  %v137_v23 = vand.u32 2147483647, %v112_v13 }
  0x1c   :  { %100 = vst [vmem:[#allocation11 + $0x8] sm:$0xff] %v98_v12  ;;  %v125_v26 = vor.u32 1.1754944e-38, %v124_v17  ;;  %vm123_vm5 = vcmp.eq.f32.partialorder %v122_v20, 8.507059e+37 }
  0x1d   :  { %155 = dma.vmem_to_hbm [thread:$0]  %s151_s27, 256, %s153_s30, [#allocation4]   ;;  %v140_v29 = vor.u32 1.1754944e-38, %v139_v21  ;;  %vm138_vm7 = vcmp.eq.f32.partialorder %v137_v23, 8.507059e+37 }
  0x20   :  { %v204_v14 = vpop.eup %203 }
  0x21   :  { %v206_v15 = vpop.eup %205  ;;  %v114_v16 = vmul.f32 %v204_v14, %v111_v9  ;;  %vm119_vm1 = vweird.f32 %v204_v14 }
  0x22   :  { %v129_v18 = vmul.f32 %v206_v15, %v112_v13  ;;  %vm134_vm3 = vweird.f32 %v206_v15  ;;  %vm481_vm4 = vmor %vm118_vm0, %vm119_vm1 }
  0x23   :  { %v115_v19 = vsub.f32 1.0, %v114_v16  ;;  %vm135_vm6 = vmor %vm133_vm2, %vm134_vm3 }
  0x24   :  { %v130_v22 = vsub.f32 1.0, %v129_v18 }
  0x25   :  { %v116_v24 = vmul.f32 %v204_v14, %v115_v19 }
  0x26   :  { %v131_v27 = vmul.f32 %v206_v15, %v130_v22 }
  0x27   :  { %v117_v28 = vadd.f32 %v204_v14, %v116_v24 }
  0x28   :  { %v132_v31 = vadd.f32 %v206_v15, %v131_v27 }
  0x29   :  { %v121_v32 = vsel %vm481_vm4, %v204_v14, %v117_v28 }
  0x2a   :  { %v126_v34 = vsel %vm123_vm5, %v125_v26, %v121_v32  ;;  %v136_v35 = vsel %vm135_vm6, %v206_v15, %v132_v31 }
  0x2b   :  { %v127_v36 = vmul.f32 %v126_v34, %v109_v30  ;;  %v141_v37 = vsel %vm138_vm7, %v140_v29, %v136_v35 }
  0x2c   :  { %v142_v38 = vmul.f32 %v141_v37, %v110_v33 }
  0x2d   :  { %143 = vst [vmem:[#allocation14] sm:$0xff] %v127_v36 }
  0x2e   :  { %144 = vst [vmem:[#allocation14 + $0x8] sm:$0xff] %v142_v38 }
  0x2f   :  { %177 = dma.vmem_to_hbm [thread:$0]  %s173_s6, 256, %s175_s10, [#allocation13]  }
  0x30   :  { %405 = dma.done.wait [#allocation4], 256  }
  0x31   :  { %406 = vsyncadd [#allocation4], 4294967040 }
  0x32   :  { %407 = dma.done.wait [#allocation13], 512  }
  0x33   :  { %408 = vsyncadd [#allocation13], 4294966784 }
  0x34   :  { %190 = vsyncpa [#allocation3], 1 }
  0x35   :  { %191 = vsyncpa [#allocation6], 1 }
  0x36   :  { %192 = vsyncpa [#allocation9], 1 }
  0x37   :  { %193 = vsyncpa [#allocation4], 1 }
  0x38   :  { %194 = vsyncpa [#allocation13], 1 }

</bundles_post_ra>
